<compile_context>
chip_gen: v7x
topology: tpu7x:2x2x1
jax: 0.10.0
libtpu: 0.0.40
codegen_flags: <defaults>
</compile_context>

<pallas_src>
import jax
import jax.numpy as jnp
from jax.experimental import pallas as pl
from jax.experimental.pallas import tpu as pltpu

LANE = 128
SUBLANE = 8


def _round_up(n, m):
    return ((n + m - 1) // m) * m


def _cdiv(a, b):
    return -(-a // b)


def mlp_kernel(x_ref, w1_ref, b1_ref, w2_ref, b2_ref, o_ref):
    # hidden = relu(x @ W1 + b1): bf16 MXU inputs, f32 accumulation/elementwise.
    x = x_ref[...].astype(jnp.bfloat16)                       # cast in-kernel (VPU)
    h = jnp.dot(x, w1_ref[...], preferred_element_type=jnp.float32)
    h = jnp.maximum(h + b1_ref[...], 0.0)                     # (tile_b, Hp) f32
    # y = hidden @ W2 + b2
    y = jnp.dot(h.astype(jnp.bfloat16), w2_ref[...],
                preferred_element_type=jnp.float32)
    o_ref[...] = (y + b2_ref[...]).astype(o_ref.dtype)        # (tile_b, O)


def prepare_params(w1, b1, w2, b2):
    """One-time parameter prep (call once, reuse every forward).

    w1: (F, H), b1: (H,) or (1, H), w2: (H, O), b2: (O,) or (1, O).
    Hidden dim is lane-padded to 128; weights cast to bf16 for the MXU,
    biases kept f32 for the VPU add.
    """
    F, H = w1.shape
    O = w2.shape[1]
    Hp = _round_up(H, LANE)
    b1 = jnp.reshape(b1, (1, H))
    b2 = jnp.reshape(b2, (1, O))
    w1p = jnp.zeros((F, Hp), jnp.bfloat16).at[:, :H].set(w1.astype(jnp.bfloat16))
    b1p = jnp.zeros((1, Hp), jnp.float32).at[:, :H].set(b1.astype(jnp.float32))
    w2p = jnp.zeros((Hp, O), jnp.bfloat16).at[:H, :].set(w2.astype(jnp.bfloat16))
    b2p = b2.astype(jnp.float32)
    return w1p, b1p, w2p, b2p


def _batch_tiling(B, *, max_tile_b=1024):
    """Pick (tile_b, Bp, grid) with balanced tiles; >=2 tiles for larger B so
    the "parallel" batch axis shards across both TensorCores on v7x."""
    Bp8 = _round_up(B, SUBLANE)
    if Bp8 <= 256:
        return Bp8, Bp8, 1                       # tiny batch: single tile
    n_tiles = max(_cdiv(Bp8, max_tile_b), 2)     # megacore-friendly grid
    tile_b = _round_up(_cdiv(Bp8, n_tiles), SUBLANE)
    Bp = _round_up(B, tile_b)
    return tile_b, Bp, Bp // tile_b


def net_forward(x, params, *, max_tile_b=1024):
    """x: (B, F) f32; params = prepare_params(...) -> (B, O)."""
    w1p, b1p, w2p, b2p = params
    B, F = x.shape
    assert w1p.shape[0] == F, "feature dim mismatch between x and prepared W1"
    Hp = w1p.shape[1]
    O = w2p.shape[1]
    out_dtype = x.dtype

    tile_b, Bp, grid_b = _batch_tiling(B, max_tile_b=max_tile_b)
    xp = x if Bp == B else jnp.zeros((Bp, F), x.dtype).at[:B].set(x)

    cost = pl.CostEstimate(
        flops=2 * Bp * (F * Hp + Hp * O),
        transcendentals=0,
        bytes_accessed=(xp.size * xp.dtype.itemsize
                        + w1p.size * 2 + w2p.size * 2
                        + b1p.size * 4 + b2p.size * 4
                        + Bp * O * 4),
    )

    out = pl.pallas_call(
        mlp_kernel,
        out_shape=jax.ShapeDtypeStruct((Bp, O), jnp.float32),
        grid=(grid_b,),
        in_specs=[
            pl.BlockSpec((tile_b, F), lambda i: (i, 0)),   # x: batch-tiled, F unpadded
            pl.BlockSpec((F, Hp), lambda i: (0, 0)),       # W1: VMEM-resident
            pl.BlockSpec((1, Hp), lambda i: (0, 0)),       # b1
            pl.BlockSpec((Hp, O), lambda i: (0, 0)),       # W2: VMEM-resident
            pl.BlockSpec((1, O), lambda i: (0, 0)),        # b2
        ],
        out_specs=pl.BlockSpec((tile_b, O), lambda i: (i, 0)),
        compiler_params=pltpu.CompilerParams(
            dimension_semantics=("parallel",),             # megacore on v7x
        ),
        cost_estimate=cost,
    )(xp, w1p, b1p, w2p, b2p)

    out = out if Bp == B else out[:B]
    return out.astype(out_dtype)


def init_params(key, n_feature, n_hidden, n_output, dtype=jnp.float32):
    """Deterministic init mimicking nn.Linear's Kaiming-uniform-ish ranges."""
    k1, k2, k3, k4 = jax.random.split(key, 4)
    lim1 = 1.0 / jnp.sqrt(n_feature)
    lim2 = 1.0 / jnp.sqrt(n_hidden)
    # Stored pre-transposed: (in_dim, out_dim)
    w1 = jax.random.uniform(k1, (n_feature, n_hidden), dtype, -lim1, lim1)
    b1 = jax.random.uniform(k2, (1, n_hidden), dtype, -lim1, lim1)
    w2 = jax.random.uniform(k3, (n_hidden, n_output), dtype, -lim2, lim2)
    b2 = jax.random.uniform(k4, (1, n_output), dtype, -lim2, lim2)
    return w1, b1, w2, b2


if __name__ == "__main__":
    n_feature, n_hidden, n_output = 16, 32, 8

    key = jax.random.PRNGKey(0)
    kx, kp, kx2 = jax.random.split(key, 3)
    w1, b1, w2, b2 = init_params(kp, n_feature, n_hidden, n_output)

    # One-time parameter prep (hoisted out of the forward path).
    params = prepare_params(w1, b1, w2, b2)
    forward = jax.jit(net_forward)

    # Small batch (single tile).
    batch = 8
    x = jax.random.normal(kx, (batch, n_feature), jnp.float32)
    y = jax.block_until_ready(forward(x, params))
    ref = jnp.maximum(x @ w1 + b1, 0.0) @ w2 + b2
    assert y.shape == (batch, n_output)
    assert jnp.allclose(y, ref, atol=5e-2, rtol=5e-2)

    # Larger, non-multiple batch exercising the balanced batch grid (2 x 504).
    batch2 = 1000
    x2 = jax.random.normal(kx2, (batch2, n_feature), jnp.float32)
    y2 = jax.block_until_ready(forward(x2, params))
    ref2 = jnp.maximum(x2 @ w1 + b1, 0.0) @ w2 + b2
    assert y2.shape == (batch2, n_output)
    assert jnp.allclose(y2, ref2, atol=5e-2, rtol=5e-2)

    print("KERNEL_OK")
</pallas_src>

<mosaic_0001>
module attributes {stable_mosaic.version = 11 : i64} {
  func.func @mlp_kernel(%arg0: i32, %arg1: memref<8x16xf32, #tpu.memory_space<vmem>>, %arg2: memref<16x128xbf16, #tpu.memory_space<vmem>>, %arg3: memref<1x128xf32, #tpu.memory_space<vmem>>, %arg4: memref<128x8xbf16, #tpu.memory_space<vmem>>, %arg5: memref<1x8xf32, #tpu.memory_space<vmem>>, %arg6: memref<8x8xf32, #tpu.memory_space<vmem>>) attributes {dimension_semantics = [#tpu.dimension_semantics<parallel>], iteration_bounds = array<i64: 1>, scalar_prefetch = 0 : i64, scratch_operands = 0 : i64, tpu.core_type = #tpu.core_type<tc>, window_params = [{transform_indices = @transform_0, window_bounds = array<i64: 8, 16>}, {pipeline_mode = #tpu.pipeline_mode<synchronous>, transform_indices = @transform_1, window_bounds = array<i64: 16, 128>}, {pipeline_mode = #tpu.pipeline_mode<synchronous>, transform_indices = @transform_2, window_bounds = array<i64: 1, 128>}, {pipeline_mode = #tpu.pipeline_mode<synchronous>, transform_indices = @transform_3, window_bounds = array<i64: 128, 8>}, {pipeline_mode = #tpu.pipeline_mode<synchronous>, transform_indices = @transform_4, window_bounds = array<i64: 1, 8>}, {transform_indices = @transform_5, window_bounds = array<i64: 8, 8>}]} {
    %c0 = arith.constant 0 : index
    %c0_0 = arith.constant 0 : index
    %0 = vector.load %arg1[%c0, %c0_0] : memref<8x16xf32, #tpu.memory_space<vmem>>, vector<8x16xf32>
    %1 = arith.truncf %0 : vector<8x16xf32> to vector<8x16xbf16>
    %c0_1 = arith.constant 0 : index
    %c0_2 = arith.constant 0 : index
    %2 = vector.load %arg2[%c0_1, %c0_2] : memref<16x128xbf16, #tpu.memory_space<vmem>>, vector<16x128xbf16>
    %cst = arith.constant dense<0.000000e+00> : vector<8x128xf32>
    %3 = tpu.matmul %1, %2, %cst {dimension_numbers = #tpu.dot_dimension_numbers<[1], [0], [0], [1], [0, 0, 1, 1], [], []>} : vector<8x16xbf16>, vector<16x128xbf16>, vector<8x128xf32> -> vector<8x128xf32>
    %c0_3 = arith.constant 0 : index
    %c0_4 = arith.constant 0 : index
    %4 = vector.load %arg3[%c0_3, %c0_4] : memref<1x128xf32, #tpu.memory_space<vmem>>, vector<1x128xf32>
    %5 = vector.broadcast %4 : vector<1x128xf32> to vector<8x128xf32>
    %6 = arith.addf %3, %5 : vector<8x128xf32>
    %cst_5 = arith.constant 0.000000e+00 : f32
    %7 = vector.broadcast %cst_5 : f32 to vector<8x128xf32>
    %8 = arith.maximumf %6, %7 : vector<8x128xf32>
    %9 = arith.truncf %8 : vector<8x128xf32> to vector<8x128xbf16>
    %c0_6 = arith.constant 0 : index
    %c0_7 = arith.constant 0 : index
    %10 = vector.load %arg4[%c0_6, %c0_7] : memref<128x8xbf16, #tpu.memory_space<vmem>>, vector<128x8xbf16>
    %cst_8 = arith.constant dense<0.000000e+00> : vector<8x8xf32>
    %11 = tpu.matmul %9, %10, %cst_8 {dimension_numbers = #tpu.dot_dimension_numbers<[1], [0], [0], [1], [0, 0, 1, 1], [], []>} : vector<8x128xbf16>, vector<128x8xbf16>, vector<8x8xf32> -> vector<8x8xf32>
    %c0_9 = arith.constant 0 : index
    %c0_10 = arith.constant 0 : index
    %12 = vector.load %arg5[%c0_9, %c0_10] : memref<1x8xf32, #tpu.memory_space<vmem>>, vector<1x8xf32>
    %13 = vector.broadcast %12 : vector<1x8xf32> to vector<8x8xf32>
    %14 = arith.addf %11, %13 : vector<8x8xf32>
    %c0_11 = arith.constant 0 : index
    %c0_12 = arith.constant 0 : index
    %15 = vector.load %arg6[%c0_11, %c0_12] : memref<8x8xf32, #tpu.memory_space<vmem>>, vector<8x8xf32>
    tpu.vector_store %arg6[%c0_11, %c0_12], %14 {strides = array<i32>} : memref<8x8xf32, #tpu.memory_space<vmem>>, vector<8x8xf32>,
    return
  }
  func.func @transform_0(%arg0: i32) -> (i32, i32) {
    %c0_i32 = arith.constant 0 : i32
    %c0_i32_0 = arith.constant 0 : i32
    return %arg0, %c0_i32 : i32, i32
  }
  func.func @transform_1(%arg0: i32) -> (i32, i32) {
    %c0_i32 = arith.constant 0 : i32
    %c0_i32_0 = arith.constant 0 : i32
    %c0_i32_1 = arith.constant 0 : i32
    return %c0_i32, %c0_i32_0 : i32, i32
  }
  func.func @transform_2(%arg0: i32) -> (i32, i32) {
    %c0_i32 = arith.constant 0 : i32
    %c0_i32_0 = arith.constant 0 : i32
    %c0_i32_1 = arith.constant 0 : i32
    return %c0_i32, %c0_i32_0 : i32, i32
  }
  func.func @transform_3(%arg0: i32) -> (i32, i32) {
    %c0_i32 = arith.constant 0 : i32
    %c0_i32_0 = arith.constant 0 : i32
    %c0_i32_1 = arith.constant 0 : i32
    return %c0_i32, %c0_i32_0 : i32, i32
  }
  func.func @transform_4(%arg0: i32) -> (i32, i32) {
    %c0_i32 = arith.constant 0 : i32
    %c0_i32_0 = arith.constant 0 : i32
    %c0_i32_1 = arith.constant 0 : i32
    return %c0_i32, %c0_i32_0 : i32, i32
  }
  func.func @transform_5(%arg0: i32) -> (i32, i32) {
    %c0_i32 = arith.constant 0 : i32
    %c0_i32_0 = arith.constant 0 : i32
    return %arg0, %c0_i32 : i32, i32
  }
}

</mosaic_0001>

<bundles_post_ra>
// kernel: net_forward.1
= control target key start
LH: loop header
LB: loop body
LE: loop exit
PB: predicated region body
PF: predicated region fallthrough
CT: control target
= control target key end

     0   :  { %v297_v1 = vmov 0.0   ;;  %vm39_vm0 = vcmask 130048   ;;  %vm298_vm1 = vmmov 0   ;;  %s378_s0 = inlined_call_operand.vmem [shape: f32[8,16], index: 0, kind: input, shape index: {}]   ;;  %s379_s1 = inlined_call_operand.vmem [shape: bf16[16,128], index: 1, kind: input, shape index: {}]   ;;  %s380_s2 = inlined_call_operand.vmem [shape: f32[1,128], index: 2, kind: input, shape index: {}]   ;;  %s381_s3 = inlined_call_operand.vmem [shape: bf16[128,8], index: 3, kind: input, shape index: {}]   ;;  %s382_s4 = inlined_call_operand.vmem [shape: f32[1,8], index: 4, kind: input, shape index: {}]   ;;  %s383_s5 = inlined_call_operand.hbm [shape: f32[8,8], index: 5, kind: output, shape index: {}]  }
   0x1   :  { %v264_v0 = vld [vmem:[%s379_s1] sm:$0xff]   ;;  %235 = vmatprep.subr.bf16.mxu0 %v297_v1  ;;  %241 = vmatprep.subr.bf16.mxu1 %v297_v1  ;;  %v266_v5 = vld [vmem:[%s381_s3 + $0x8] sm:$0xff]   ;;  %v267_v6 = vld [vmem:[%s381_s3 + $0x10] sm:$0xff]  }
   0x2   :  { %v22_v2 = vld [vmem:[%s378_s0] sm:$0xff]  ;;  %236 = vmatpush3.bf16.msra.mxu0 %v264_v0  ;;  %237 = vmatprep.mubr.msk.bf16.mxu0 %vm298_vm1, %v297_v1 }
   0x3   :  { %v265_v3 = vld [vmem:[%s381_s3] sm:$0xff]   ;;  %v23_v4 = vpack.c.bf16 %v22_v2, %v22_v2  ;;  %257 = vmatprep.mubr.msk.bf16.mxu1 %vm298_vm1, %v297_v1 }
   0x4   :  { %242 = vmatpush3.bf16.msra.mxu1 %v265_v3 }
   0x5   :  { %243 = vmatprep.subr.bf16.mxu1 %v297_v1  ;;  %238 = vmatmul.mubr.msk.bf16.vlgmr.msra.gmra.mrb[0].mxu0 %vm39_vm0, %v23_v4 }
   0x8   :  { %244 = vmatpush3.bf16.msra.mxu1 %v266_v5 }
   0x9   :  { %245 = vmatprep.subr.bf16.mxu1 %v297_v1 }
   0xa   :  { %10 = vsyncpa [#allocation3], 0  ;;  %v268_v7 = vld [vmem:[%s381_s3 + $0x18] sm:$0xff]   ;;  %v269_v8 = vld [vmem:[%s381_s3 + $0x20] sm:$0xff]   ;;  %s299_s15 = smov [#allocation2]   ;;  %vm196_vm2 = vcmask 64512  }
   0xb   :  { %v270_v9 = vld [vmem:[%s381_s3 + $0x28] sm:$0xff]   ;;  %v271_v10 = vld [vmem:[%s381_s3 + $0x30] sm:$0xff]   ;;  %v272_v11 = vld [vmem:[%s381_s3 + $0x38] sm:$0xff]   ;;  %s204_s16 = sshll.u32 %s299_s15, 4  ;;  %s205_s16 = int_to_ptr.vmem [resolvable:$true] %s204_s16 }
   0xc   :  { %246 = vmatpush3.bf16.msra.mxu1 %v267_v6  ;;  %v212_v12 = vld [vmem:[%s380_s2] ss:$0 sm:$0xff]  ;;  %s273_s2 = scalar_lea.vmem %s205_s16, 128  ;;  %p278_p1 = scmp.lt.s32.totalorder %s205_s16, %s205_s16 }
   0xd   :  { %247 = vmatprep.subr.bf16.mxu1 %v297_v1  ;;  %v215_v20 = vld [vmem:[%s382_s4] ss:$0 sm:$0xff]  ;;  %p274_p0 = scmp.ne.s32.totalorder %s205_s16, %s273_s2  ;;  %p279_p2 = scmp.lt.s32.totalorder %s273_s2, %s273_s2 }
   0xf   :  { %p280_p3 = por %p279_p2, %p278_p1 }
  0x10   :  { %248 = vmatpush3.bf16.msra.mxu1 %v268_v7 }
  0x11   :  { %249 = vmatprep.subr.bf16.mxu1 %v297_v1  ;;  %p281_p4 = pnand %p280_p3, %p274_p0 }
  0x14   :  { %250 = vmatpush3.bf16.msra.mxu1 %v269_v8 }
  0x15   :  { %251 = vmatprep.subr.bf16.mxu1 %v297_v1 }
  0x18   :  { %252 = vmatpush3.bf16.msra.mxu1 %v270_v9 }
  0x19   :  { %253 = vmatprep.subr.bf16.mxu1 %v297_v1 }
  0x1c   :  { %254 = vmatpush3.bf16.msra.mxu1 %v271_v10 }
  0x1d   :  { %255 = vmatprep.subr.bf16.mxu1 %v297_v1 }
  0x20   :  { %256 = vmatpush3.bf16.msra.mxu1 %v272_v11 }
  0xd8   :  { %v77_v13 = vpop.f32.mrb[0].mxu0 }
  0xd9   :  { %v78_v14 = vadd.f32 %v212_v12, %v77_v13  ;;  %v239_v15 = vpop.f32.mrb[1].mxu0 }
  0xda   :  { %v80_v16 = vpop.f32.mrb[2].mxu0 }
  0xdb   :  { %v83_v17 = vmax.f32 %v78_v14, 0.0  ;;  %v240_v18 = vpop.f32.mrb[3].mxu0 }
  0xdd   :  { %v84_v19 = vpack.c.bf16 %v83_v17, %v83_v17 }
  0xdf   :  { %258 = vmatmul.mubr.bf16.vlgmr.msra.gmra.mrb[0].mxu1 %v84_v19 }
 0x1b2   :  { %v190_v21 = vpop.f32.mrb[0].mxu1 }
 0x1b3   :  { %v191_v22 = vadd.f32 %v215_v20, %v190_v21  ;;  %v259_v23 = vpop.f32.mrb[1].mxu1 }
 0x1b4   :  { %v193_v24 = vpop.f32.mrb[2].mxu1 }
 0x1b5   :  { %v260_v25 = vpop.f32.mrb[3].mxu1  ;;  %197 = vst.msk [vmem:[#allocation2] sm:$0xff] %vm196_vm2, %v191_v22 }
 0x1b6   :  { %284 = shalt.err (!%p281_p4)
}
 0x1b7   :  { %s285_s4 = scalar_lea.hbm %s383_s5, 128 }
 0x1b8   :  { %p286_p5 = scmp.ne.s32.totalorder %s383_s5, %s285_s4  ;;  %p289_p6 = scmp.lt.u32.totalorder %s285_s4, %s383_s5 }
 0x1ba   :  { %p291_p7 = pnand %p289_p6, %p286_p5 }
 0x1bc   :  { %294 = shalt.err (!%p291_p7)
}
 0x1bd   :  { %207 = dma.vmem_to_hbm [thread:$0]  %s205_s16, 128, %s383_s5, [#allocation3]  }
 0x1be   :  { %295 = dma.done.wait [#allocation3], 128  }
 0x1bf   :  { %296 = vsyncadd [#allocation3], 4294967168 }
 0x1c0   :  { %211 = vsyncpa [#allocation3], 1 }

</bundles_post_ra>
